<compile_context>
chip_gen: v7x
topology: tpu7x:2x2x1
jax: 0.10.0
libtpu: 0.0.40
codegen_flags: <defaults>
</compile_context>

<pallas_src>
import functools

import jax
import jax.numpy as jnp
from jax.experimental import pallas as pl
from jax.experimental.pallas import tpu as pltpu

_LANE = 128


def _multiloss_kernel(logits_ref, targets_ref, s1_ref, s2_ref, coeffs_ref,
                      loss_ref,
                      acc1_ref, acc2_ref, ce_ref, l2_ref,
                      *,
                      n_rows_logits, tile_logits, mask_logits,
                      rows1, tile1, mask1,
                      rows2, tile2, mask2,
                      inv_n, inv_nc, inv_n1sq, inv_n2sq):
    step = pl.program_id(0)

    # ----- init accumulators (partial sums persist across the grid) ---------
    @pl.when(step == 0)
    def _init():
        acc1_ref[...] = jnp.zeros_like(acc1_ref)
        acc2_ref[...] = jnp.zeros_like(acc2_ref)
        ce_ref[...] = jnp.zeros_like(ce_ref)
        l2_ref[...] = jnp.zeros_like(l2_ref)

    # ----- streamed skip-slab partial sums (VPU-only per step) --------------
    def _slab_accumulate(acc_ref, x_ref, rows_total, tr, needs_mask):
        rem = rows_total - step * tr          # rows of this stream still valid

        @pl.when(rem > 0)
        def _():
            x = x_ref[...].astype(jnp.float32)          # native-dtype stream
            if needs_mask:
                row = jax.lax.broadcasted_iota(jnp.int32, x.shape, 0)
                x = jnp.where(row < rem, x, 0.0)        # mask ragged tail
            if tr % 8 == 0:
                # (8, lane) accumulator: tile-split reshape + axis-0 sum is
                # pure vreg-wise adds; no per-step cross-sublane XLU reduce.
                acc_ref[...] += x.reshape(tr // 8, 8, x.shape[1]).sum(axis=0)
            else:
                # tiny slab (single full-dim block): one sublane reduce total.
                acc_ref[0:1, :] += jnp.sum(x, axis=0, keepdims=True)

    _slab_accumulate(acc1_ref, s1_ref, rows1, tile1, mask1)
    _slab_accumulate(acc2_ref, s2_ref, rows2, tile2, mask2)

    # ----- row-tiled CE + L2 partials, overlapped with the DMA-bound loop ---
    rem_l = n_rows_logits - step * tile_logits

    @pl.when(rem_l > 0)
    def _ce_l2():
        logits = logits_ref[...].astype(jnp.float32)    # (tile_logits, C)
        tn, c = logits.shape
        m = jnp.max(logits, axis=1, keepdims=True)
        lse = m + jnp.log(jnp.sum(jnp.exp(logits - m), axis=1, keepdims=True))
        col = jax.lax.broadcasted_iota(jnp.int32, (tn, c), 1)
        onehot = col == targets_ref[...]                # (tn, C) bool
        tgt = jnp.sum(jnp.where(onehot, logits, 0.0), axis=1, keepdims=True)
        per_row = lse - tgt                             # (tn, 1)
        if mask_logits:
            row = jax.lax.broadcasted_iota(jnp.int32, (tn, c), 0)
            valid = row < rem_l
            per_row = jnp.where(valid[:, 0:1], per_row, 0.0)
            logits = jnp.where(valid, logits, 0.0)
        ce_ref[...] += jnp.sum(per_row, axis=(0, 1), keepdims=True)
        l2_ref[...] += jnp.sum(logits * logits, axis=(0, 1), keepdims=True)

    # ----- finalize: single cross-lane reduce + scalar combine --------------
    @pl.when(step == pl.num_programs(0) - 1)
    def _finalize():
        ce = jnp.sum(ce_ref[...]) * inv_n
        l2 = jnp.sum(l2_ref[...]) * inv_nc
        skip1 = jnp.sum(acc1_ref[...]) * inv_n1sq       # mean(x)/numel
        skip2 = jnp.sum(acc2_ref[...]) * inv_n2sq
        a_scaled = coeffs_ref[0]                        # SMEM scalars
        b_scaled = coeffs_ref[1]
        loss_ref[0, 0] = ce + a_scaled * (skip1 + skip2) + b_scaled * l2


def _round_up(v, m):
    return ((v + m - 1) // m) * m


def _to_rows(x):
    """Lane-dense (rows, 128) view of x in its native dtype.

    For contiguous inputs whose element count is a multiple of 128 this is a
    metadata-only reshape (no HBM copy, no cast).
    """
    flat = x.reshape(-1)
    pad = (-flat.size) % _LANE
    if pad:
        # TODO(synk): mask this <128-element tail in-kernel instead of the
        # concatenate copy for element counts not divisible by 128.
        flat = jnp.concatenate([flat, jnp.zeros((pad,), flat.dtype)])
    return flat.reshape(-1, _LANE)


def _pick_tiles(rows_per_stream, caps):
    """Pick per-stream tile rows so every stream finishes in ~the same number
    of grid steps (keeps all DMA streams in flight on every step)."""
    t = 1
    for rows, cap in zip(rows_per_stream, caps):
        t = max(t, -(-rows // min(rows, cap)))
    tiles, counts = [], []
    for rows, cap in zip(rows_per_stream, caps):
        tr = -(-rows // t)
        if tr < rows:
            tr = _round_up(tr, 8)
        if tr >= rows:
            tr = rows                      # full-dim block is always legal
        tr = max(tr, 1)
        tiles.append(tr)
        counts.append(-(-rows // tr))
    return tiles, counts, max(counts + [1])


def multi_loss(outputs, targets, skip_connections, alpha, beta,
               gamma1=0.001, gamma2=0.01, delta1=0.0001, delta2=0.001,
               *, logits_tile_rows=256):
    """JAX/Pallas equivalent of MultiLoss.forward."""
    n, c = outputs.shape
    targets_2d = targets.reshape(n, 1).astype(jnp.int32)

    s1 = skip_connections[2]
    s2 = skip_connections[3]
    n1 = float(s1.size)
    n2 = float(s2.size)

    # Copy-free, native-dtype lane-dense views of the skip slabs.
    s1_rows = _to_rows(s1)
    s2_rows = _to_rows(s2)
    rows1, rows2 = s1_rows.shape[0], s2_rows.shape[0]

    # Streamed-tile target: ~2 MiB tiles on 128-MiB-VMEM parts (v5e/v6e),
    # ~1 MiB on v7x (64 MiB physical VMEM).
    try:
        vmem_cap = int(pltpu.get_tpu_info().vmem_capacity_bytes)
    except Exception:  # conservative default if the query is unavailable
        vmem_cap = 64 << 20
    tile_bytes = (2 << 20) if vmem_cap >= (96 << 20) else (1 << 20)

    def _row_cap(dtype):
        per_row = _LANE * jnp.dtype(dtype).itemsize
        return max(8, (tile_bytes // per_row) // 8 * 8)

    logits_cap = _round_up(min(logits_tile_rows, max(n, 1)), 8)
    (tile1, tile2, tile_l), (cnt1, cnt2, cnt_l), t_grid = _pick_tiles(
        [rows1, rows2, n],
        [_row_cap(s1_rows.dtype), _row_cap(s2_rows.dtype), logits_cap])

    # Sigmoid gating of the learnable scalars: two scalar ops, done in the
    # wrapper (XLA fuses for free), passed as SMEM scalars.
    a_scaled = gamma1 + (gamma2 - gamma1) * jax.nn.sigmoid(
        jnp.asarray(alpha, jnp.float32))
    b_scaled = delta1 + (delta2 - delta1) * jax.nn.sigmoid(
        jnp.asarray(beta, jnp.float32))
    coeffs = jnp.stack([a_scaled, b_scaled]).astype(jnp.float32)  # (2,)

    kernel = functools.partial(
        _multiloss_kernel,
        n_rows_logits=n, tile_logits=tile_l, mask_logits=(n % tile_l != 0),
        rows1=rows1, tile1=tile1, mask1=(rows1 % tile1 != 0),
        rows2=rows2, tile2=tile2, mask2=(rows2 % tile2 != 0),
        inv_n=1.0 / float(n),
        inv_nc=1.0 / float(n * c),
        inv_n1sq=1.0 / (n1 * n1),
        inv_n2sq=1.0 / (n2 * n2),
    )

    # VMEM budget: every stream is double-buffered (account for VMEM lane
    # padding of narrow blocks) + the small accumulators.
    lanes_c = _round_up(c, _LANE)
    vmem_need = (
        2 * tile1 * _LANE * s1_rows.dtype.itemsize
        + 2 * tile2 * _LANE * s2_rows.dtype.itemsize
        + 2 * tile_l * lanes_c * outputs.dtype.itemsize
        + 2 * tile_l * _LANE * 4            # targets block, lane-padded
        + 4 * 8 * _LANE * 4                 # accumulators + slop
    )
    vmem_limit = int(min(max(2 * vmem_need, 8 << 20), 32 << 20))

    cost = pl.CostEstimate(
        flops=int(2 * (s1_rows.size + s2_rows.size) + 12 * n * c),
        transcendentals=int(n * c),
        bytes_accessed=int(s1_rows.size * s1_rows.dtype.itemsize
                           + s2_rows.size * s2_rows.dtype.itemsize
                           + n * c * outputs.dtype.itemsize + 4 * n + 16),
    )

    # NOTE: if xprof ever shows exposed DMA at step boundaries, bump the slab
    # BlockSpecs with pipeline_mode=pl.Buffered(3) (cheap; check VMEM first).
    grid_spec = pltpu.PrefetchScalarGridSpec(
        num_scalar_prefetch=0,
        grid=(t_grid,),
        in_specs=[
            pl.BlockSpec((tile_l, c), lambda i: (jnp.minimum(i, cnt_l - 1), 0)),
            pl.BlockSpec((tile_l, 1), lambda i: (jnp.minimum(i, cnt_l - 1), 0)),
            pl.BlockSpec((tile1, _LANE), lambda i: (jnp.minimum(i, cnt1 - 1), 0)),
            pl.BlockSpec((tile2, _LANE), lambda i: (jnp.minimum(i, cnt2 - 1), 0)),
            pl.BlockSpec(memory_space=pltpu.MemorySpace.SMEM),   # (2,) coeffs
        ],
        out_specs=pl.BlockSpec(memory_space=pltpu.MemorySpace.SMEM),
        scratch_shapes=[
            pltpu.VMEM((8, _LANE), jnp.float32),   # skip-slab 1 partials
            pltpu.VMEM((8, _LANE), jnp.float32),   # skip-slab 2 partials
            pltpu.VMEM((1, 1), jnp.float32),       # CE partial
            pltpu.VMEM((1, 1), jnp.float32),       # L2 partial
        ],
    )

    loss = pl.pallas_call(
        kernel,
        out_shape=jax.ShapeDtypeStruct((1, 1), jnp.float32),
        grid_spec=grid_spec,
        compiler_params=pltpu.CompilerParams(
            dimension_semantics=("arbitrary",),
            vmem_limit_bytes=vmem_limit),
        cost_estimate=cost,
    )(outputs, targets_2d, s1_rows, s2_rows, coeffs)
    return loss[0, 0]


def _reference(outputs, targets, skip_connections, alpha, beta,
               gamma1=0.001, gamma2=0.01, delta1=0.0001, delta2=0.001):
    logp = jax.nn.log_softmax(outputs, axis=-1)
    ce = -jnp.mean(jnp.take_along_axis(logp, targets[:, None], axis=1))
    s1, s2 = skip_connections[2], skip_connections[3]
    c1 = jnp.mean(s1) / s1.size
    c2 = jnp.mean(s2) / s2.size
    l2 = jnp.mean(outputs ** 2)
    a = gamma1 + (gamma2 - gamma1) * jax.nn.sigmoid(alpha)
    b = delta1 + (delta2 - delta1) * jax.nn.sigmoid(beta)
    return ce + a * (c1 + c2) + b * l2


if __name__ == "__main__":
    key = jax.random.PRNGKey(0)
    k1, k2, k3, k4, k5, k6 = jax.random.split(key, 6)

    N, C = 8, 32
    outputs = jax.random.normal(k1, (N, C), jnp.float32)
    targets = jax.random.randint(k2, (N,), 0, C, jnp.int32)
    skip_connections = [
        jax.random.normal(k3, (2, 4, 16, 16), jnp.float32),
        jax.random.normal(k4, (2, 8, 8, 8), jnp.float32),
        jax.random.normal(k5, (2, 4, 16, 16), jnp.float32),
        jax.random.normal(k6, (2, 8, 8, 8), jnp.float32),
    ]
    # Matches nn.Parameter(torch.tensor(0.0)).
    alpha = jnp.float32(0.0)
    beta = jnp.float32(0.0)

    loss = multi_loss(outputs, targets, skip_connections, alpha, beta)
    jax.block_until_ready(loss)

    ref = _reference(outputs, targets, skip_connections, alpha, beta)
    assert jnp.allclose(loss, ref, rtol=1e-5, atol=1e-5), (loss, ref)

    print("KERNEL_OK")
</pallas_src>

<mosaic_0001>
module attributes {stable_mosaic.version = 11 : i64} {
  func.func @_multiloss_kernel(%arg0: i32, %arg1: memref<8x32xf32, #tpu.memory_space<vmem>>, %arg2: memref<8x1xi32, #tpu.memory_space<vmem>>, %arg3: memref<16x128xf32, #tpu.memory_space<vmem>>, %arg4: memref<8x128xf32, #tpu.memory_space<vmem>>, %arg5: memref<2xf32, #tpu.memory_space<smem>>, %arg6: memref<1x1xf32, #tpu.memory_space<smem>>, %arg7: memref<8x128xf32, #tpu.memory_space<vmem>>, %arg8: memref<8x128xf32, #tpu.memory_space<vmem>>, %arg9: memref<1x1xf32, #tpu.memory_space<vmem>>, %arg10: memref<1x1xf32, #tpu.memory_space<vmem>>) attributes {dimension_semantics = [#tpu.dimension_semantics<arbitrary>], iteration_bounds = array<i64: 1>, scalar_prefetch = 0 : i64, scratch_operands = 4 : i64, tpu.core_type = #tpu.core_type<tc>, window_params = [{transform_indices = @transform_0, window_bounds = array<i64: 8, 32>}, {transform_indices = @transform_1, window_bounds = array<i64: 8, 1>}, {transform_indices = @transform_2, window_bounds = array<i64: 16, 128>}, {transform_indices = @transform_3, window_bounds = array<i64: 8, 128>}, {transform_indices = @transform_4, window_bounds = array<i64: 2>}, {transform_indices = @transform_5, window_bounds = array<i64: 1, 1>}]} {
    %c0_i32 = arith.constant 0 : i32
    %0 = arith.cmpi eq, %arg0, %c0_i32 : i32
    %1 = arith.extui %0 : i1 to i32
    %c0_i32_0 = arith.constant 0 : i32
    %2 = arith.cmpi ne, %1, %c0_i32_0 : i32
    scf.if %2 {
      %cst = arith.constant 0.000000e+00 : f32
      %21 = vector.broadcast %cst : f32 to vector<8x128xf32>
      %c0 = arith.constant 0 : index
      %c0_13 = arith.constant 0 : index
      %22 = vector.load %arg7[%c0, %c0_13] : memref<8x128xf32, #tpu.memory_space<vmem>>, vector<8x128xf32>
      tpu.vector_store %arg7[%c0, %c0_13], %21 {strides = array<i32>} : memref<8x128xf32, #tpu.memory_space<vmem>>, vector<8x128xf32>,
      %cst_14 = arith.constant 0.000000e+00 : f32
      %23 = vector.broadcast %cst_14 : f32 to vector<8x128xf32>
      %c0_15 = arith.constant 0 : index
      %c0_16 = arith.constant 0 : index
      %24 = vector.load %arg8[%c0_15, %c0_16] : memref<8x128xf32, #tpu.memory_space<vmem>>, vector<8x128xf32>
      tpu.vector_store %arg8[%c0_15, %c0_16], %23 {strides = array<i32>} : memref<8x128xf32, #tpu.memory_space<vmem>>, vector<8x128xf32>,
      %cst_17 = arith.constant 0.000000e+00 : f32
      %25 = vector.broadcast %cst_17 : f32 to vector<1x1xf32>
      %c0_18 = arith.constant 0 : index
      %c0_19 = arith.constant 0 : index
      %26 = vector.load %arg9[%c0_18, %c0_19] : memref<1x1xf32, #tpu.memory_space<vmem>>, vector<1x1xf32>
      tpu.vector_store %arg9[%c0_18, %c0_19], %25 {strides = array<i32>} : memref<1x1xf32, #tpu.memory_space<vmem>>, vector<1x1xf32>,
      %cst_20 = arith.constant 0.000000e+00 : f32
      %27 = vector.broadcast %cst_20 : f32 to vector<1x1xf32>
      %c0_21 = arith.constant 0 : index
      %c0_22 = arith.constant 0 : index
      %28 = vector.load %arg10[%c0_21, %c0_22] : memref<1x1xf32, #tpu.memory_space<vmem>>, vector<1x1xf32>
      tpu.vector_store %arg10[%c0_21, %c0_22], %27 {strides = array<i32>} : memref<1x1xf32, #tpu.memory_space<vmem>>, vector<1x1xf32>,
    } else {
    }
    %c16_i32 = arith.constant 16 : i32
    %3 = arith.muli %arg0, %c16_i32 : i32
    %c16_i32_1 = arith.constant 16 : i32
    %4 = arith.subi %c16_i32_1, %3 : i32
    %c0_i32_2 = arith.constant 0 : i32
    %5 = arith.cmpi sgt, %4, %c0_i32_2 : i32
    %6 = arith.extui %5 : i1 to i32
    %c0_i32_3 = arith.constant 0 : i32
    %7 = arith.cmpi ne, %6, %c0_i32_3 : i32
    scf.if %7 {
      %c0 = arith.constant 0 : index
      %c0_13 = arith.constant 0 : index
      %21 = vector.load %arg3[%c0, %c0_13] : memref<16x128xf32, #tpu.memory_space<vmem>>, vector<16x128xf32>
      %c0_14 = arith.constant 0 : index
      %c0_15 = arith.constant 0 : index
      %22 = vector.load %arg7[%c0_14, %c0_15] : memref<8x128xf32, #tpu.memory_space<vmem>>, vector<8x128xf32>
      %23 = vector.shape_cast %21 : vector<16x128xf32> to vector<2x8x128xf32>
      %cst = arith.constant dense<0.000000e+00> : vector<8x128xf32>
      %24 = vector.multi_reduction <add>, %23, %cst [0] : vector<2x8x128xf32> to vector<8x128xf32>
      %25 = arith.addf %22, %24 : vector<8x128xf32>
      %c0_16 = arith.constant 0 : index
      %c0_17 = arith.constant 0 : index
      %26 = vector.load %arg7[%c0_16, %c0_17] : memref<8x128xf32, #tpu.memory_space<vmem>>, vector<8x128xf32>
      tpu.vector_store %arg7[%c0_16, %c0_17], %25 {strides = array<i32>} : memref<8x128xf32, #tpu.memory_space<vmem>>, vector<8x128xf32>,
    } else {
    }
    %c8_i32 = arith.constant 8 : i32
    %8 = arith.muli %arg0, %c8_i32 : i32
    %c8_i32_4 = arith.constant 8 : i32
    %9 = arith.subi %c8_i32_4, %8 : i32
    %c0_i32_5 = arith.constant 0 : i32
    %10 = arith.cmpi sgt, %9, %c0_i32_5 : i32
    %11 = arith.extui %10 : i1 to i32
    %c0_i32_6 = arith.constant 0 : i32
    %12 = arith.cmpi ne, %11, %c0_i32_6 : i32
    scf.if %12 {
      %c0 = arith.constant 0 : index
      %c0_13 = arith.constant 0 : index
      %21 = vector.load %arg4[%c0, %c0_13] : memref<8x128xf32, #tpu.memory_space<vmem>>, vector<8x128xf32>
      %c0_14 = arith.constant 0 : index
      %c0_15 = arith.constant 0 : index
      %22 = vector.load %arg8[%c0_14, %c0_15] : memref<8x128xf32, #tpu.memory_space<vmem>>, vector<8x128xf32>
      %23 = vector.shape_cast %21 : vector<8x128xf32> to vector<1x8x128xf32>
      %cst = arith.constant dense<0.000000e+00> : vector<8x128xf32>
      %24 = vector.multi_reduction <add>, %23, %cst [0] : vector<1x8x128xf32> to vector<8x128xf32>
      %25 = arith.addf %22, %24 : vector<8x128xf32>
      %c0_16 = arith.constant 0 : index
      %c0_17 = arith.constant 0 : index
      %26 = vector.load %arg8[%c0_16, %c0_17] : memref<8x128xf32, #tpu.memory_space<vmem>>, vector<8x128xf32>
      tpu.vector_store %arg8[%c0_16, %c0_17], %25 {strides = array<i32>} : memref<8x128xf32, #tpu.memory_space<vmem>>, vector<8x128xf32>,
    } else {
    }
    %c8_i32_7 = arith.constant 8 : i32
    %13 = arith.muli %arg0, %c8_i32_7 : i32
    %c8_i32_8 = arith.constant 8 : i32
    %14 = arith.subi %c8_i32_8, %13 : i32
    %c0_i32_9 = arith.constant 0 : i32
    %15 = arith.cmpi sgt, %14, %c0_i32_9 : i32
    %16 = arith.extui %15 : i1 to i32
    %c0_i32_10 = arith.constant 0 : i32
    %17 = arith.cmpi ne, %16, %c0_i32_10 : i32
    scf.if %17 {
      %c0 = arith.constant 0 : index
      %c0_13 = arith.constant 0 : index
      %21 = vector.load %arg1[%c0, %c0_13] : memref<8x32xf32, #tpu.memory_space<vmem>>, vector<8x32xf32>
      %cst = arith.constant dense<0xFF800000> : vector<8xf32>
      %22 = vector.multi_reduction <maximumf>, %21, %cst [1] : vector<8x32xf32> to vector<8xf32>
      %23 = vector.shape_cast %22 : vector<8xf32> to vector<8x1xf32>
      %24 = vector.broadcast %23 : vector<8x1xf32> to vector<8x32xf32>
      %25 = arith.subf %21, %24 : vector<8x32xf32>
      %26 = math.exp %25 : vector<8x32xf32>
      %cst_14 = arith.constant dense<0.000000e+00> : vector<8xf32>
      %27 = vector.multi_reduction <add>, %26, %cst_14 [1] : vector<8x32xf32> to vector<8xf32>
      %28 = vector.shape_cast %27 : vector<8xf32> to vector<8x1xf32>
      %29 = math.log %28 : vector<8x1xf32>
      %30 = arith.addf %23, %29 : vector<8x1xf32>
      %31 = tpu.iota {dimensions = array<i32: 1>} : vector<8x32xi32>
      %c0_15 = arith.constant 0 : index
      %c0_16 = arith.constant 0 : index
      %32 = vector.load %arg2[%c0_15, %c0_16] : memref<8x1xi32, #tpu.memory_space<vmem>>, vector<8x1xi32>
      %33 = vector.broadcast %32 : vector<8x1xi32> to vector<8x32xi32>
      %34 = arith.cmpi eq, %31, %33 : vector<8x32xi32>
      %cst_17 = arith.constant 0.000000e+00 : f32
      %35 = vector.broadcast %cst_17 : f32 to vector<8x32xf32>
      %36 = arith.select %34, %21, %35 : vector<8x32xi1>, vector<8x32xf32>
      %cst_18 = arith.constant dense<0.000000e+00> : vector<8xf32>
      %37 = vector.multi_reduction <add>, %36, %cst_18 [1] : vector<8x32xf32> to vector<8xf32>
      %38 = vector.shape_cast %37 : vector<8xf32> to vector<8x1xf32>
      %39 = arith.subf %30, %38 : vector<8x1xf32>
      %c0_19 = arith.constant 0 : index
      %c0_20 = arith.constant 0 : index
      %40 = vector.load %arg9[%c0_19, %c0_20] : memref<1x1xf32, #tpu.memory_space<vmem>>, vector<1x1xf32>
      %41 = vector.shape_cast %39 : vector<8x1xf32> to vector<1x8x1xf32>
      %cst_21 = arith.constant dense<0.000000e+00> : vector<1xf32>
      %42 = vector.multi_reduction <add>, %41, %cst_21 [1, 2] : vector<1x8x1xf32> to vector<1xf32>
      %43 = vector.shape_cast %42 : vector<1xf32> to vector<1x1x1xf32>
      %44 = vector.extract %43[0, 0, 0] : f32 from vector<1x1x1xf32>
      %45 = vector.broadcast %44 : f32 to vector<1x1xf32>
      %46 = arith.addf %40, %45 : vector<1x1xf32>
      %c0_22 = arith.constant 0 : index
      %c0_23 = arith.constant 0 : index
      %47 = vector.load %arg9[%c0_22, %c0_23] : memref<1x1xf32, #tpu.memory_space<vmem>>, vector<1x1xf32>
      tpu.vector_store %arg9[%c0_22, %c0_23], %46 {strides = array<i32>} : memref<1x1xf32, #tpu.memory_space<vmem>>, vector<1x1xf32>,
      %c0_24 = arith.constant 0 : index
      %c0_25 = arith.constant 0 : index
      %48 = vector.load %arg10[%c0_24, %c0_25] : memref<1x1xf32, #tpu.memory_space<vmem>>, vector<1x1xf32>
      %49 = arith.mulf %21, %21 : vector<8x32xf32>
      %50 = vector.shape_cast %49 : vector<8x32xf32> to vector<1x8x32xf32>
      %cst_26 = arith.constant dense<0.000000e+00> : vector<1xf32>
      %51 = vector.multi_reduction <add>, %50, %cst_26 [1, 2] : vector<1x8x32xf32> to vector<1xf32>
      %52 = vector.shape_cast %51 : vector<1xf32> to vector<1x1x1xf32>
      %53 = vector.extract %52[0, 0, 0] : f32 from vector<1x1x1xf32>
      %54 = vector.broadcast %53 : f32 to vector<1x1xf32>
      %55 = arith.addf %48, %54 : vector<1x1xf32>
      %c0_27 = arith.constant 0 : index
      %c0_28 = arith.constant 0 : index
      %56 = vector.load %arg10[%c0_27, %c0_28] : memref<1x1xf32, #tpu.memory_space<vmem>>, vector<1x1xf32>
      tpu.vector_store %arg10[%c0_27, %c0_28], %55 {strides = array<i32>} : memref<1x1xf32, #tpu.memory_space<vmem>>, vector<1x1xf32>,
    } else {
    }
    %c0_i32_11 = arith.constant 0 : i32
    %18 = arith.cmpi eq, %arg0, %c0_i32_11 : i32
    %19 = arith.extui %18 : i1 to i32
    %c0_i32_12 = arith.constant 0 : i32
    %20 = arith.cmpi ne, %19, %c0_i32_12 : i32
    scf.if %20 {
      %c0 = arith.constant 0 : index
      %c0_13 = arith.constant 0 : index
      %21 = vector.load %arg9[%c0, %c0_13] : memref<1x1xf32, #tpu.memory_space<vmem>>, vector<1x1xf32>
      %22 = vector.shape_cast %21 : vector<1x1xf32> to vector<1x1x1xf32>
      %cst = arith.constant dense<0.000000e+00> : vector<1xf32>
      %23 = vector.multi_reduction <add>, %22, %cst [1, 2] : vector<1x1x1xf32> to vector<1xf32>
      %24 = vector.shape_cast %23 : vector<1xf32> to vector<1x1x1xf32>
      %25 = vector.extract %24[0, 0, 0] : f32 from vector<1x1x1xf32>
      %cst_14 = arith.constant 1.250000e-01 : f32
      %26 = arith.mulf %25, %cst_14 : f32
      %c0_15 = arith.constant 0 : index
      %c0_16 = arith.constant 0 : index
      %27 = vector.load %arg10[%c0_15, %c0_16] : memref<1x1xf32, #tpu.memory_space<vmem>>, vector<1x1xf32>
      %28 = vector.shape_cast %27 : vector<1x1xf32> to vector<1x1x1xf32>
      %cst_17 = arith.constant dense<0.000000e+00> : vector<1xf32>
      %29 = vector.multi_reduction <add>, %28, %cst_17 [1, 2] : vector<1x1x1xf32> to vector<1xf32>
      %30 = vector.shape_cast %29 : vector<1xf32> to vector<1x1x1xf32>
      %31 = vector.extract %30[0, 0, 0] : f32 from vector<1x1x1xf32>
      %cst_18 = arith.constant 3.906250e-03 : f32
      %32 = arith.mulf %31, %cst_18 : f32
      %c0_19 = arith.constant 0 : index
      %c0_20 = arith.constant 0 : index
      %33 = vector.load %arg7[%c0_19, %c0_20] : memref<8x128xf32, #tpu.memory_space<vmem>>, vector<8x128xf32>
      %34 = vector.shape_cast %33 : vector<8x128xf32> to vector<1x8x128xf32>
      %cst_21 = arith.constant dense<0.000000e+00> : vector<1xf32>
      %35 = vector.multi_reduction <add>, %34, %cst_21 [1, 2] : vector<1x8x128xf32> to vector<1xf32>
      %36 = vector.shape_cast %35 : vector<1xf32> to vector<1x1x1xf32>
      %37 = vector.extract %36[0, 0, 0] : f32 from vector<1x1x1xf32>
      %cst_22 = arith.constant 2.38418579E-7 : f32
      %38 = arith.mulf %37, %cst_22 : f32
      %c0_23 = arith.constant 0 : index
      %c0_24 = arith.constant 0 : index
      %39 = vector.load %arg8[%c0_23, %c0_24] : memref<8x128xf32, #tpu.memory_space<vmem>>, vector<8x128xf32>
      %40 = vector.shape_cast %39 : vector<8x128xf32> to vector<1x8x128xf32>
      %cst_25 = arith.constant dense<0.000000e+00> : vector<1xf32>
      %41 = vector.multi_reduction <add>, %40, %cst_25 [1, 2] : vector<1x8x128xf32> to vector<1xf32>
      %42 = vector.shape_cast %41 : vector<1xf32> to vector<1x1x1xf32>
      %43 = vector.extract %42[0, 0, 0] : f32 from vector<1x1x1xf32>
      %cst_26 = arith.constant 9.53674316E-7 : f32
      %44 = arith.mulf %43, %cst_26 : f32
      %c0_27 = arith.constant 0 : index
      %45 = memref.load %arg5[%c0_27] : memref<2xf32, #tpu.memory_space<smem>>
      %c1 = arith.constant 1 : index
      %46 = memref.load %arg5[%c1] : memref<2xf32, #tpu.memory_space<smem>>
      %47 = arith.addf %38, %44 : f32
      %48 = arith.mulf %45, %47 : f32
      %49 = arith.addf %26, %48 : f32
      %50 = arith.mulf %46, %32 : f32
      %51 = arith.addf %49, %50 : f32
      %c0_28 = arith.constant 0 : index
      %c0_29 = arith.constant 0 : index
      %52 = memref.load %arg6[%c0_28, %c0_29] : memref<1x1xf32, #tpu.memory_space<smem>>
      memref.store %51, %arg6[%c0_28, %c0_29] : memref<1x1xf32, #tpu.memory_space<smem>>
    } else {
    }
    return
  }
  func.func @transform_0(%arg0: i32) -> (i32, i32) {
    %c0_i32 = arith.constant 0 : i32
    %0 = arith.minsi %arg0, %c0_i32 : i32
    %c0_i32_0 = arith.constant 0 : i32
    %c0_i32_1 = arith.constant 0 : i32
    return %0, %c0_i32_0 : i32, i32
  }
  func.func @transform_1(%arg0: i32) -> (i32, i32) {
    %c0_i32 = arith.constant 0 : i32
    %0 = arith.minsi %arg0, %c0_i32 : i32
    %c0_i32_0 = arith.constant 0 : i32
    %c0_i32_1 = arith.constant 0 : i32
    return %0, %c0_i32_0 : i32, i32
  }
  func.func @transform_2(%arg0: i32) -> (i32, i32) {
    %c0_i32 = arith.constant 0 : i32
    %0 = arith.minsi %arg0, %c0_i32 : i32
    %c0_i32_0 = arith.constant 0 : i32
    %c0_i32_1 = arith.constant 0 : i32
    return %0, %c0_i32_0 : i32, i32
  }
  func.func @transform_3(%arg0: i32) -> (i32, i32) {
    %c0_i32 = arith.constant 0 : i32
    %0 = arith.minsi %arg0, %c0_i32 : i32
    %c0_i32_0 = arith.constant 0 : i32
    %c0_i32_1 = arith.constant 0 : i32
    return %0, %c0_i32_0 : i32, i32
  }
  func.func @transform_4(%arg0: i32) -> i32 {
    %c0_i32 = arith.constant 0 : i32
    %c0_i32_0 = arith.constant 0 : i32
    return %c0_i32 : i32
  }
  func.func @transform_5(%arg0: i32) -> (i32, i32) {
    %c0_i32 = arith.constant 0 : i32
    %c0_i32_0 = arith.constant 0 : i32
    %c0_i32_1 = arith.constant 0 : i32
    return %c0_i32, %c0_i32_0 : i32, i32
  }
}

</mosaic_0001>

<bundles_post_ra>
// kernel: tpu_custom_call.1
= control target key start
LH: loop header
LB: loop body
LE: loop exit
PB: predicated region body
PF: predicated region fallthrough
CT: control target
= control target key end

     0   :  { %10 = vsyncpa [#allocation7], 0  ;;  %s395_s0 = inlined_call_operand.hbm [shape: f32[8,32], index: 0, kind: input, shape index: {}]   ;;  %s396_s1 = inlined_call_operand.vmem [shape: s32[8,1], index: 1, kind: input, shape index: {}]   ;;  %s397_s2 = inlined_call_operand.vmem [shape: f32[16,128], index: 2, kind: input, shape index: {}]   ;;  %s398_s3 = inlined_call_operand.hbm [shape: f32[8,128], index: 3, kind: input, shape index: {}]   ;;  %s399_s4 = inlined_call_operand.vmem [shape: f32[2], index: 4, kind: input, shape index: {}]   ;;  %s400_s5 = inlined_call_operand.hbm [shape: f32[1,1], index: 5, kind: output, shape index: {}]  }
   0x1   :  { %11 = vsyncpa [#allocation11], 0 }
   0x2   :  { %12 = vsyncpa [#allocation9], 0 }
   0x3   :  { %13 = vsyncpa [#allocation8], 0  ;;  %s303_s18 = smov [#allocation6]   ;;  %s304_s20 = smov [#allocation10]  }
   0x4   :  { %s20_s19 = sshll.u32 %s303_s18, 4  ;;  %s34_s21 = sshll.u32 %s304_s20, 4  ;;  %s21_s19 = int_to_ptr.vmem [resolvable:$true] %s20_s19  ;;  %s35_s21 = int_to_ptr.vmem [resolvable:$true] %s34_s21 }
   0x5   :  { %s229_s24 = scalar_lea.hbm %s395_s0, 128 }
   0x6   :  { %p230_p0 = scmp.ne.s32.totalorder %s395_s0, %s229_s24  ;;  %p233_p1 = scmp.lt.u32.totalorder %s229_s24, %s395_s0 }
   0x8   :  { %p235_p2 = pnand %p233_p1, %p230_p0 }
   0xa   :  { %238 = shalt.err (!%p235_p2)
}
   0xb   :  { %s239_s29 = scalar_lea.vmem %s21_s19, 128  ;;  %p244_p4 = scmp.lt.s32.totalorder %s21_s19, %s21_s19 }
   0xc   :  { %p240_p3 = scmp.ne.s32.totalorder %s21_s19, %s239_s29  ;;  %p245_p5 = scmp.lt.s32.totalorder %s239_s29, %s239_s29 }
   0xe   :  { %p246_p6 = por %p245_p5, %p244_p4 }
  0x10   :  { %p247_p7 = pnand %p246_p6, %p240_p3 }
  0x12   :  { %250 = shalt.err (!%p247_p7)
}
  0x13   :  { %23 = dma.hbm_to_vmem [thread:$0]  %s395_s0, 128, %s21_s19, [#allocation7]  }
  0x14   :  { %s251_s9 = scalar_lea.hbm %s398_s3, 128 }
  0x15   :  { %p252_p8 = scmp.ne.s32.totalorder %s398_s3, %s251_s9  ;;  %p255_p9 = scmp.lt.u32.totalorder %s251_s9, %s398_s3 }
  0x17   :  { %p257_p10 = pnand %p255_p9, %p252_p8 }
  0x19   :  { %260 = shalt.err (!%p257_p10)
}
  0x1a   :  { %s261_s14 = scalar_lea.vmem %s35_s21, 128  ;;  %p266_p12 = scmp.lt.s32.totalorder %s35_s21, %s35_s21 }
  0x1b   :  { %p262_p11 = scmp.ne.s32.totalorder %s35_s21, %s261_s14  ;;  %p267_p13 = scmp.lt.s32.totalorder %s261_s14, %s261_s14 }
  0x1d   :  { %p268_p0 = por %p267_p13, %p266_p12 }
  0x1f   :  { %p269_p1 = pnand %p268_p0, %p262_p11 }
  0x21   :  { %272 = shalt.err (!%p269_p1)
}
  0x22   :  { %37 = dma.hbm_to_vmem [thread:$0]  %s398_s3, 128, %s35_s21, [#allocation11]  }
  0x23   :  { %s44_s18 = sshll.u32 %s399_s4, 4  ;;  %s45_s18 = int_to_ptr.vmem [resolvable:$true] %s44_s18 }
  0x24   :  { %s273_s19 = scalar_lea.vmem %s45_s18, 16  ;;  %p278_p3 = scmp.lt.s32.totalorder %s45_s18, %s45_s18 }
  0x25   :  { %p274_p2 = scmp.ne.s32.totalorder %s45_s18, %s273_s19  ;;  %p279_p4 = scmp.lt.s32.totalorder %s273_s19, %s273_s19 }
  0x27   :  { %p280_p5 = por %p279_p4, %p278_p3 }
  0x29   :  { %p281_p6 = pnand %p280_p5, %p274_p2 }
  0x2b   :  { %284 = shalt.err (!%p281_p6)
}
  0x2c   :  { %s305_s20 = smov [#allocation12]  }
  0x2d   :  { %47 = dma.vmem_to_smem %s45_s18, 16, %s305_s20, [#allocation9]  }
  0x2e   :  { %295 = dma.done.wait [#allocation7], 128  }
  0x2f   :  { %296 = vsyncadd [#allocation7], 4294967168 }
  0x30   :  { %297 = dma.done.wait [#allocation11], 128  }
  0x31   :  { %298 = vsyncadd [#allocation11], 4294967168 }
  0x32   :  { %299 = dma.done.wait [#allocation9], 16  }
  0x33   :  { %300 = vsyncadd [#allocation9], 4294967280 }
  0x34   :  { %57 = sfence }
  0x35   :  { %v90_v0 = vld [vmem:[#allocation6] sm:$0xff]  ;;  %vm91_vm0 = vcmask 261120   ;;  %v306_v2 = vmov 0   ;;  %v104_v7 = vlaneseq  ;;  %vm117_vm2 = vcmask 7168   ;;  %v85_v26 = vld [vmem:[#allocation10] sm:$0xff]  ;;  %s180_s27 = sld [smem:[#allocation12]] }
  0x36   :  { %v92_v1 = vsel %vm91_vm0, %v90_v0, -inf  ;;  %224 = vset.pattern.permute.xlu0 %v306_v2  ;;  %v106_v3 = vld [vmem:[%s396_s1] sm:$0xff]  ;;  %v133_v20 = vmul.f32 %v90_v0, %v90_v0  ;;  %v74_v24 = vld [vmem:[%s397_s2 + $0x8] sm:$0xff]  ;;  %vm64_vm3 = vcmask 0   ;;  %v307_v27 = vmov 0.0   ;;  %s205_s28 = sld [smem:[#allocation12 + $0x1]] }
  0x37   :  { %93 = vmax.xlane.f32.xlu0 %v92_v1  ;;  %v105_v8 = vand.u32 127, %v104_v7  ;;  %v73_v23 = vld [vmem:[%s397_s2] sm:$0xff]  ;;  %65 = vst.msk [vmem:[#allocation4] sm:$0x1] %vm64_vm3, %v307_v27  ;;  %66 = vst.msk [vmem:[#allocation5] sm:$0x1] %vm64_vm3, %v307_v27 }
  0x38   :  { %v134_v22 = vsel %vm91_vm0, %v133_v20, 0.0  ;;  %v76_v25 = vadd.f32 %v74_v24, %v73_v23  ;;  %s285_s16 = scalar_lea.hbm %s400_s5, 16 }
  0x39   :  { %p286_p7 = scmp.ne.s32.totalorder %s400_s5, %s285_s16  ;;  %p289_p8 = scmp.lt.u32.totalorder %s285_s16, %s400_s5 }
  0x3b   :  { %p291_p9 = pnand %p289_p8, %p286_p7 }
  0x3e   :  { %v116_v47 = vld [vmem:[#allocation4] sm:$0x1]  ;;  %v132_v52 = vld [vmem:[#allocation5] sm:$0x1] }
  0x4d   :  { %108 = vperm.xlu0 %224, %v106_v3  }
  0xc4   :  { %v94_v4 = vpop.xlane.xlu0 %93 }
  0xc5   :  { %v95_v5 = vsub.f32 %v90_v0, %v94_v4 }
  0xc7   :  { %v96_v6 = vmul.f32 1.442695, %v95_v5 }
  0xc9   :  { %225 = vpow2.f32 %v96_v6 }
  0xcc   :  { %v109_v9 = vpop.permute.xlu0 %108 }
  0xcd   :  { %vm110_vm1 = vcmp.eq.s32.totalorder %v105_v8, %v109_v9 }
  0xce   :  { %v111_v11 = vsel %vm110_vm1, %v90_v0, 0.0 }
  0xcf   :  { %v112_v13 = vsel %vm91_vm0, %v111_v11, 0.0 }
  0xd3   :  { %v226_v10 = vpop.eup %225 }
  0xd4   :  { %v98_v12 = vsel %vm91_vm0, %v226_v10, 0.0 }
  0xd5   :  { %99 = vadd.xlane.f32.xlu1 %v98_v12 }
  0xd9   :  { %113 = vadd.xlane.f32.xlu1 %v112_v13 }
 0x162   :  { %v100_v14 = vpop.xlane.xlu1 %99 }
 0x163   :  { %227 = vlog2.f32 %v100_v14 }
 0x166   :  { %v114_v17 = vpop.xlane.xlu1 %113 }
 0x16d   :  { %v228_v15 = vpop.eup %227 }
 0x16e   :  { %v102_v16 = vmul.f32 0.6931472, %v228_v15 }
 0x170   :  { %v103_v18 = vadd.f32 %v102_v16, %v94_v4 }
 0x172   :  { %v115_v19 = vsub.f32 %v103_v18, %v114_v17 }
 0x174   :  { %v118_v21 = vsel %vm117_vm2, %v115_v19, 0.0 }
 0x175   :  { %119 = vadd.xlane.f32.xlu1 %v118_v21 }
 0x179   :  { %135 = vadd.xlane.f32.xlu1 %v134_v22 }
 0x17d   :  { %159 = vadd.xlane.f32.xlu1 %v76_v25 }
 0x181   :  { %170 = vadd.xlane.f32.xlu1 %v85_v26 }
 0x202   :  { %v120_v28 = vpop.xlane.xlu1 %119 }
 0x203   :  { %v121_v29 = vrot.slane %v120_v28, 4 }
 0x205   :  { %v122_v30 = vadd.f32 %v121_v29, %v120_v28 }
 0x206   :  { %v136_v31 = vpop.xlane.xlu1 %135 }
 0x207   :  { %v123_v32 = vrot.slane %v122_v30, 2  ;;  %v137_v33 = vrot.slane %v136_v31, 4 }
 0x209   :  { %v138_v34 = vadd.f32 %v137_v33, %v136_v31  ;;  %v124_v35 = vadd.f32 %v123_v32, %v122_v30 }
 0x20a   :  { %v160_v42 = vpop.xlane.xlu1 %159 }
 0x20b   :  { %v139_v36 = vrot.slane %v138_v34, 2  ;;  %v125_v37 = vrot.slane %v124_v35, 1  ;;  %v161_v44 = vrot.slane %v160_v42, 4 }
 0x20d   :  { %v126_v38 = vadd.f32 %v125_v37, %v124_v35  ;;  %v140_v39 = vadd.f32 %v139_v36, %v138_v34  ;;  %v162_v46 = vadd.f32 %v161_v44, %v160_v42 }
 0x20e   :  { %v171_v43 = vpop.xlane.xlu1 %170 }
 0x20f   :  { %206 = vpush %v126_v38  ;;  %v141_v40 = vrot.slane %v140_v39, 1  ;;  %v172_v45 = vrot.slane %v171_v43, 4  ;;  %v163_v51 = vrot.slane %v162_v46, 2 }
 0x211   :  { %v142_v41 = vadd.f32 %v141_v40, %v140_v39  ;;  %v173_v48 = vadd.f32 %v172_v45, %v171_v43  ;;  %v164_v56 = vadd.f32 %v163_v51, %v162_v46 }
 0x213   :  { %208 = vpush %v142_v41  ;;  %v174_v53 = vrot.slane %v173_v48, 2  ;;  %v165_v59 = vrot.slane %v164_v56, 1 }
 0x215   :  { %v175_v57 = vadd.f32 %v174_v53, %v173_v48  ;;  %v166_v62 = vadd.f32 %v165_v59, %v164_v56 }
 0x217   :  { %v176_v60 = vrot.slane %v175_v57, 1 }
 0x219   :  { %v177_v63 = vadd.f32 %v176_v60, %v175_v57 }
 0x240   :  { %s207_s2 = spop %206 }
 0x241   :  { %v128_v49 = vstv %s207_s2 }
 0x242   :  { %v129_v50 = vadd.f32 %v128_v49, %v116_v47 }
 0x244   :  { %131 = vst.msk [vmem:[#allocation4] sm:$0x1] %vm64_vm3, %v129_v50  ;;  %s209_s24 = spop %208 }
 0x245   :  { %v144_v54 = vstv %s209_s24 }
 0x246   :  { %v145_v55 = vadd.f32 %v144_v54, %v132_v52 }
 0x248   :  { %146 = vst.msk [vmem:[#allocation5] sm:$0x1] %vm64_vm3, %v145_v55 }
 0x24b   :  { %v150_v58 = vld [vmem:[#allocation4] sm:$0x1] }
 0x24c   :  { %210 = vpush %v150_v58 }
 0x24f   :  { %v154_v61 = vld [vmem:[#allocation5] sm:$0x1] }
 0x250   :  { %212 = vpush %v154_v61 }
 0x251   :  { %214 = vpush %v166_v62 }
 0x252   :  { %216 = vpush %v177_v63 }
 0x27d   :  { %s211_s25 = spop %210 }
 0x27e   :  { %s153_s10 = smul.f32 0.125, %s211_s25 }
 0x281   :  { %s213_s26 = spop %212 }
 0x282   :  { %s215_s29 = spop %214  ;;  %s157_s8 = smul.f32 0.00390625, %s213_s26 }
 0x283   :  { %s168_s30 = smul.f32 2.3841858e-07, %s215_s29  ;;  %s217_s6 = spop %216 }
 0x284   :  { %s179_s7 = smul.f32 9.536743e-07, %s217_s6 }
 0x285   :  { %s185_s12 = smul.f32 %s205_s28, %s157_s8 }
 0x286   :  { %s182_s9 = sadd.f32 %s179_s7, %s168_s30 }
 0x288   :  { %s183_s11 = smul.f32 %s182_s9, %s180_s27 }
 0x28a   :  { %s184_s13 = sadd.f32 %s183_s11, %s153_s10 }
 0x28c   :  { %s186_s14 = sadd.f32 %s185_s12, %s184_s13 }
 0x28e   :  { %188 = sst [smem:[#allocation13]] %s186_s14 }
 0x28f   :  { %294 = shalt.err (!%p291_p9)
}
 0x290   :  { %s308_s3 = smov [#allocation13]  }
 0x291   :  { %196 = dma.smem_to_hbm %s308_s3, 16, %s400_s5, [#allocation8]  }
 0x292   :  { %301 = dma.done.wait [#allocation8], 16  }
 0x293   :  { %302 = vsyncadd [#allocation8], 4294967280 }
 0x294   :  { %200 = sfence }
 0x295   :  { %201 = vsyncpa [#allocation7], 1 }
 0x296   :  { %202 = vsyncpa [#allocation11], 1 }
 0x297   :  { %203 = vsyncpa [#allocation8], 1 }
 0x298   :  { %204 = vsyncpa [#allocation9], 1 }

</bundles_post_ra>
